<compile_context>
chip_gen: v7x
topology: tpu7x:2x2x1
jax: 0.10.0
libtpu: 0.0.40
codegen_flags: <defaults>
</compile_context>

<pallas_src>
import functools

import jax
import jax.numpy as jnp
from jax.experimental import pallas as pl
from jax.experimental.pallas import tpu as pltpu


def _gcol_loss_kernel(x_ref, a_ref, o_ref, acc_ref, *, inv_batch):
    # x_ref: (TB, V, C)  predictions tile (bf16), resident across the row-tile axis
    # a_ref: (TB, TU, V) adjacency row-slab (bf16), pipelined
    # o_ref: (TU, C) f32 per-core partial output, resident per core
    # acc_ref: (TU, C) f32 scratch accumulator
    j = pl.program_id(1)          # batch-tile index (serial per core)
    r = pl.program_id(2)          # u-row-tile index (serial)
    tu = a_ref.shape[1]

    @pl.when(jnp.logical_and(j == 0, r == 0))
    def _init():
        acc_ref[...] = jnp.zeros_like(acc_ref)

    x = x_ref[...]                                          # (TB, V, C) bf16
    a = a_ref[...]                                          # (TB, TU, V) bf16
    # Batched MXU matmul, contraction over V (the large, lane-dense axis), f32 accumulate.
    ax = jnp.einsum("buv,bvc->buc", a, x,
                    preferred_element_type=jnp.float32)     # (TB, TU, C) f32

    u0 = pl.multiple_of(r * tu, 8)
    x_rows = x_ref[:, pl.ds(u0, tu), :]                     # (TB, TU, C) bf16 (small tile)

    # Per-step partial keeps lane/sublane shape: only vreg adds on the VPU,
    # no cross-lane reduce and no 1-element RMW store inside the loop.
    acc_ref[...] += jnp.sum(ax * x_rows, axis=0)            # (TU, C) f32

    is_last = jnp.logical_and(j == pl.num_programs(1) - 1,
                              r == pl.num_programs(2) - 1)

    @pl.when(is_last)
    def _finalize():
        o_ref[...] = acc_ref[...] * inv_batch


def custom_gcol_loss(predictions: jnp.ndarray, adj_matrix: jnp.ndarray, *,
                     num_cores: int = 2,
                     max_tile_batch: int = 1024,
                     compute_dtype=jnp.bfloat16) -> jnp.ndarray:
    """predictions: (B, V, C); adj_matrix: (B, V, V). Returns the scalar loss."""
    b, v, c = predictions.shape
    assert adj_matrix.shape == (b, v, v), (predictions.shape, adj_matrix.shape)

    # Lane-dense padding: V to a multiple of 128 (lanes of the A stream / M of the matmul),
    # C to a multiple of 16 (bf16 sublane packing).  Zero padding contributes exactly 0 loss.
    v_pad = ((v + 127) // 128) * 128
    c_pad = ((c + 15) // 16) * 16

    # Generation-aware VMEM budget (v5e/v6e: 128 MiB, v7x: 64 MiB physical).
    try:
        vmem_phys = int(pltpu.get_tpu_info().vmem_capacity_bytes)
    except Exception:
        vmem_phys = 64 * 1024 * 1024  # conservative fallback (v7x)
    buffer_budget = min(48 * 1024 * 1024, vmem_phys // 3)
    vmem_limit = int(min(100 * 1024 * 1024,
                         max(32 * 1024 * 1024, vmem_phys - 16 * 1024 * 1024)))

    in_itemsize = jnp.dtype(compute_dtype).itemsize

    def per_item_bytes(tu):
        a_stream = 2 * in_itemsize * tu * v_pad        # double-buffered A row-slab
        x_stream = 2 * in_itemsize * v_pad * c_pad     # double-buffered X tile
        interm = 3 * 4 * tu * c_pad                    # f32 intermediates (ax, upcast rows, prod)
        return a_stream + x_stream + interm

    # Row-tile A so a single batch item fits the budget (keeps large-V graphs feasible).
    tu = v_pad
    while tu % 16 == 0 and tu > 8 and per_item_bytes(tu) > buffer_budget:
        tu //= 2
    num_row_tiles = v_pad // tu

    # Batch tile: as big as the budget allows (amortizes ~0.35 us/step overhead).
    tb = max(1, buffer_budget // per_item_bytes(tu))
    tb = int(min(tb, max_tile_batch, pl.cdiv(b, num_cores)))
    tiles_per_core = int(pl.cdiv(b, num_cores * tb))
    b_pad = num_cores * tiles_per_core * tb

    # Narrow the HBM streams (kernel is bandwidth-bound on the adjacency stream).
    x = predictions.astype(compute_dtype)
    a = adj_matrix.astype(compute_dtype)
    x = jnp.pad(x, ((0, b_pad - b), (0, v_pad - v), (0, c_pad - c)))
    a = jnp.pad(a, ((0, b_pad - b), (0, v_pad - v), (0, v_pad - v)))

    kernel = functools.partial(_gcol_loss_kernel, inv_batch=1.0 / b)

    out = pl.pallas_call(
        kernel,
        out_shape=jax.ShapeDtypeStruct((num_cores * tu, c_pad), jnp.float32),
        grid=(num_cores, tiles_per_core, num_row_tiles),
        in_specs=[
            # X tile: constant over the row-tile axis -> stays resident, no re-DMA.
            pl.BlockSpec((tb, v_pad, c_pad),
                         lambda co, j, r: (co * tiles_per_core + j, 0, 0)),
            # A row-slab: streamed over batch tiles and u-row tiles.
            pl.BlockSpec((tb, tu, v_pad),
                         lambda co, j, r: (co * tiles_per_core + j, r, 0)),
        ],
        out_specs=pl.BlockSpec((tu, c_pad), lambda co, j, r: (co, 0)),
        scratch_shapes=[pltpu.VMEM((tu, c_pad), jnp.float32)],
        compiler_params=pltpu.CompilerParams(
            dimension_semantics=("parallel", "arbitrary", "arbitrary"),
            vmem_limit_bytes=vmem_limit,
        ),
    )(x, a)

    # Tiny final reduction over per-core / per-lane partials (done by XLA).
    return jnp.sum(out)


def _reference_loss(predictions: jnp.ndarray, adj_matrix: jnp.ndarray) -> jnp.ndarray:
    """Pure-JAX f32 mirror of the forward with the same constraint_approx."""
    scores = jnp.einsum("bvc,buc->bvu", predictions, predictions)
    return jnp.sum(adj_matrix * scores) / predictions.shape[0]


if __name__ == "__main__":
    key = jax.random.PRNGKey(0)
    batch, vertices, colors = 2, 16, 8
    k1, k2 = jax.random.split(key)

    logits = jax.random.normal(k1, (batch, vertices, colors), dtype=jnp.float32)
    predictions = jax.nn.softmax(logits, axis=-1)            # per-vertex color distribution

    upper = (jax.random.uniform(k2, (batch, vertices, vertices)) < 0.3).astype(jnp.float32)
    upper = jnp.triu(upper, k=1)
    adj_matrix = upper + jnp.transpose(upper, (0, 2, 1))      # symmetric 0/1, zero diagonal

    loss = custom_gcol_loss(predictions, adj_matrix)
    jax.block_until_ready(loss)

    ref = _reference_loss(predictions, adj_matrix)
    # bf16 inputs with f32 MXU accumulation -> loosened tolerance vs. the f32 reference.
    assert jnp.allclose(loss, ref, rtol=2e-2, atol=1e-3), (loss, ref)

    print("KERNEL_OK")
</pallas_src>

<mosaic_0001>
module attributes {stable_mosaic.version = 11 : i64} {
  func.func @_gcol_loss_kernel(%arg0: i32, %arg1: i32, %arg2: i32, %arg3: memref<1x128x16xbf16, #tpu.memory_space<vmem>>, %arg4: memref<1x128x128xbf16, #tpu.memory_space<vmem>>, %arg5: memref<128x16xf32, #tpu.memory_space<vmem>>, %arg6: memref<128x16xf32, #tpu.memory_space<vmem>>) attributes {dimension_semantics = [#tpu.dimension_semantics<parallel>, #tpu.dimension_semantics<arbitrary>, #tpu.dimension_semantics<arbitrary>], iteration_bounds = array<i64: 2, 1, 1>, scalar_prefetch = 0 : i64, scratch_operands = 1 : i64, tpu.core_type = #tpu.core_type<tc>, window_params = [{transform_indices = @transform_0, window_bounds = array<i64: 1, 128, 16>}, {transform_indices = @transform_1, window_bounds = array<i64: 1, 128, 128>}, {transform_indices = @transform_2, window_bounds = array<i64: 128, 16>}]} {
    %c0_i32 = arith.constant 0 : i32
    %0 = arith.cmpi eq, %arg1, %c0_i32 : i32
    %c0_i32_0 = arith.constant 0 : i32
    %1 = arith.cmpi eq, %arg2, %c0_i32_0 : i32
    %2 = arith.andi %0, %1 : i1
    %3 = arith.extui %2 : i1 to i32
    %c0_i32_1 = arith.constant 0 : i32
    %4 = arith.cmpi ne, %3, %c0_i32_1 : i32
    scf.if %4 {
      %cst_17 = arith.constant 0.000000e+00 : f32
      %23 = vector.broadcast %cst_17 : f32 to vector<128x16xf32>
      %c0_18 = arith.constant 0 : index
      %c0_19 = arith.constant 0 : index
      %24 = vector.load %arg6[%c0_18, %c0_19] : memref<128x16xf32, #tpu.memory_space<vmem>>, vector<128x16xf32>
      tpu.vector_store %arg6[%c0_18, %c0_19], %23 {strides = array<i32>} : memref<128x16xf32, #tpu.memory_space<vmem>>, vector<128x16xf32>,
    } else {
    }
    %c0 = arith.constant 0 : index
    %c0_2 = arith.constant 0 : index
    %c0_3 = arith.constant 0 : index
    %5 = vector.load %arg3[%c0, %c0_2, %c0_3] : memref<1x128x16xbf16, #tpu.memory_space<vmem>>, vector<1x128x16xbf16>
    %c0_4 = arith.constant 0 : index
    %c0_5 = arith.constant 0 : index
    %c0_6 = arith.constant 0 : index
    %6 = vector.load %arg4[%c0_4, %c0_5, %c0_6] : memref<1x128x128xbf16, #tpu.memory_space<vmem>>, vector<1x128x128xbf16>
    "tpu.trace_start"() <{level = 10 : i32, message = "buv,bvc->buc"}> : () -> ()
    %cst = arith.constant dense<0.000000e+00> : vector<1x128x16xf32>
    %7 = tpu.matmul %6, %5, %cst {dimension_numbers = #tpu.dot_dimension_numbers<[2], [1], [1], [2], [0, 0, 0, 1, 1, 2], [0], [0]>} : vector<1x128x128xbf16>, vector<1x128x16xbf16>, vector<1x128x16xf32> -> vector<1x128x16xf32>
    "tpu.trace_stop"() : () -> ()
    %c128_i32 = arith.constant 128 : i32
    %8 = arith.muli %arg2, %c128_i32 : i32
    %9 = tpu.assume_multiple %8, 8 : i32
    %c0_7 = arith.constant 0 : index
    %10 = arith.index_cast %9 : i32 to index
    %c0_8 = arith.constant 0 : index
    %11 = vector.load %arg3[%c0_7, %10, %c0_8] : memref<1x128x16xbf16, #tpu.memory_space<vmem>>, vector<1x128x16xbf16>
    %c0_9 = arith.constant 0 : index
    %c0_10 = arith.constant 0 : index
    %12 = vector.load %arg6[%c0_9, %c0_10] : memref<128x16xf32, #tpu.memory_space<vmem>>, vector<128x16xf32>
    %13 = arith.extf %11 : vector<1x128x16xbf16> to vector<1x128x16xf32>
    %14 = arith.mulf %7, %13 : vector<1x128x16xf32>
    %cst_11 = arith.constant dense<0.000000e+00> : vector<128x16xf32>
    %15 = vector.multi_reduction <add>, %14, %cst_11 [0] : vector<1x128x16xf32> to vector<128x16xf32>
    %16 = arith.addf %12, %15 : vector<128x16xf32>
    %c0_12 = arith.constant 0 : index
    %c0_13 = arith.constant 0 : index
    %17 = vector.load %arg6[%c0_12, %c0_13] : memref<128x16xf32, #tpu.memory_space<vmem>>, vector<128x16xf32>
    tpu.vector_store %arg6[%c0_12, %c0_13], %16 {strides = array<i32>} : memref<128x16xf32, #tpu.memory_space<vmem>>, vector<128x16xf32>,
    %c0_i32_14 = arith.constant 0 : i32
    %18 = arith.cmpi eq, %arg1, %c0_i32_14 : i32
    %c0_i32_15 = arith.constant 0 : i32
    %19 = arith.cmpi eq, %arg2, %c0_i32_15 : i32
    %20 = arith.andi %18, %19 : i1
    %21 = arith.extui %20 : i1 to i32
    %c0_i32_16 = arith.constant 0 : i32
    %22 = arith.cmpi ne, %21, %c0_i32_16 : i32
    scf.if %22 {
      %c0_17 = arith.constant 0 : index
      %c0_18 = arith.constant 0 : index
      %23 = vector.load %arg6[%c0_17, %c0_18] : memref<128x16xf32, #tpu.memory_space<vmem>>, vector<128x16xf32>
      %cst_19 = arith.constant 5.000000e-01 : f32
      %24 = vector.broadcast %cst_19 : f32 to vector<128x16xf32>
      %25 = arith.mulf %23, %24 : vector<128x16xf32>
      %c0_20 = arith.constant 0 : index
      %c0_21 = arith.constant 0 : index
      %26 = vector.load %arg5[%c0_20, %c0_21] : memref<128x16xf32, #tpu.memory_space<vmem>>, vector<128x16xf32>
      tpu.vector_store %arg5[%c0_20, %c0_21], %25 {strides = array<i32>} : memref<128x16xf32, #tpu.memory_space<vmem>>, vector<128x16xf32>,
    } else {
    }
    return
  }
  func.func @transform_0(%arg0: i32, %arg1: i32, %arg2: i32) -> (i32, i32, i32) {
    %c1_i32 = arith.constant 1 : i32
    %0 = arith.muli %arg0, %c1_i32 : i32
    %1 = arith.addi %0, %arg1 : i32
    %c0_i32 = arith.constant 0 : i32
    %c0_i32_0 = arith.constant 0 : i32
    %c0_i32_1 = arith.constant 0 : i32
    return %1, %c0_i32, %c0_i32_0 : i32, i32, i32
  }
  func.func @transform_1(%arg0: i32, %arg1: i32, %arg2: i32) -> (i32, i32, i32) {
    %c1_i32 = arith.constant 1 : i32
    %0 = arith.muli %arg0, %c1_i32 : i32
    %1 = arith.addi %0, %arg1 : i32
    %c0_i32 = arith.constant 0 : i32
    %c0_i32_0 = arith.constant 0 : i32
    return %1, %arg2, %c0_i32 : i32, i32, i32
  }
  func.func @transform_2(%arg0: i32, %arg1: i32, %arg2: i32) -> (i32, i32) {
    %c0_i32 = arith.constant 0 : i32
    %c0_i32_0 = arith.constant 0 : i32
    return %arg0, %c0_i32 : i32, i32
  }
}

</mosaic_0001>

<bundles_post_ra>
// kernel: tpu_custom_call.1
= control target key start
LH: loop header
LB: loop body
LE: loop exit
PB: predicated region body
PF: predicated region fallthrough
CT: control target
= control target key end

     0   :  { %s934_s9 = smov 0   ;;  %s936_s10 = smov 0   ;;  %s1084_s0 = inlined_call_operand.vmem [shape: bf16[2,128,16], index: 0, kind: input, shape index: {}]   ;;  %s1085_s1 = inlined_call_operand.vmem [shape: bf16[2,128,128], index: 1, kind: input, shape index: {}]   ;;  %s1086_s2 = inlined_call_operand.vmem [shape: f32[256,16], index: 2, kind: output, shape index: {}]  }
   0x1   :  { %s938_s11 = smov 0  }
   0x2 LB: > { %s31_s12 = sadd.s32 1, %s912_s10  ;;  %p723_p0 = scmp.ge.s32.totalorder %s916_s11, 1  ;;  %s916_s11 = sphi %s938_s11, %s12_s11   ;;  %s912_s10 = sphi %s936_s10, %s1089_s10   ;;  %s908_s9 = sphi %s934_s9, %s1088_s9  }
   0x3   : > { %p33_p1 = scmp.ge.s32.totalorder %s31_s12, 2  ;;  %p156_p2 = scmp.lt.s32.totalorder %s916_s11, 3 }
   0x5   : > { %s1091_s12 = smov (%p33_p1, %s31_s12), 0  ;;  %p157_p3 = pnand %p723_p0, %p156_p2 }
   0x6   : > { %p190_p4 = scmp.lt.s32.totalorder (!%p157_p3), %s908_s9, 1  ;;  %vm221_vm0 = vcmask (!%p157_p3), 130048   ;;  %v918_v0 = vmov (!%p157_p3), 0.0   ;;  %s728_s21 = sshll.u32 (!%p157_p3), %s908_s9, 4 }
   0x7   : > { %160 = sbr.rel (%p157_p3) target bundleno = 292 (0x124), region = 28  ;;  %224 = vst.msk [vmem:[#allocation2 + $0x10] sm:$0xff] (!%p157_p3), %vm221_vm0, %v918_v0  ;;  %222 = vst.msk [vmem:[#allocation2] sm:$0xff] (!%p157_p3), %vm221_vm0, %v918_v0  ;;  %p1007_p5 = scmp.lt.s32.totalorder (!%p157_p3), %s728_s21, 31 }
   0x8   : > { %223 = vst.msk [vmem:[#allocation2 + $0x8] sm:$0xff] (!%p157_p3), %vm221_vm0, %v918_v0  ;;  %225 = vst.msk [vmem:[#allocation2 + $0x18] sm:$0xff] (!%p157_p3), %vm221_vm0, %v918_v0 }
   0x9   : > { %226 = vst.msk [vmem:[#allocation2 + $0x20] sm:$0xff] (!%p157_p3), %vm221_vm0, %v918_v0  ;;  %227 = vst.msk [vmem:[#allocation2 + $0x28] sm:$0xff] (!%p157_p3), %vm221_vm0, %v918_v0 }
   0xa   : > { %228 = vst.msk [vmem:[#allocation2 + $0x30] sm:$0xff] (!%p157_p3), %vm221_vm0, %v918_v0  ;;  %229 = vst.msk [vmem:[#allocation2 + $0x38] sm:$0xff] (!%p157_p3), %vm221_vm0, %v918_v0 }
   0xb   : > { %230 = vst.msk [vmem:[#allocation2 + $0x40] sm:$0xff] (!%p157_p3), %vm221_vm0, %v918_v0  ;;  %231 = vst.msk [vmem:[#allocation2 + $0x48] sm:$0xff] (!%p157_p3), %vm221_vm0, %v918_v0 }
   0xc   : > { %232 = vst.msk [vmem:[#allocation2 + $0x50] sm:$0xff] (!%p157_p3), %vm221_vm0, %v918_v0  ;;  %233 = vst.msk [vmem:[#allocation2 + $0x58] sm:$0xff] (!%p157_p3), %vm221_vm0, %v918_v0 }
   0xd   : > { %234 = vst.msk [vmem:[#allocation2 + $0x60] sm:$0xff] (!%p157_p3), %vm221_vm0, %v918_v0  ;;  %235 = vst.msk [vmem:[#allocation2 + $0x68] sm:$0xff] (!%p157_p3), %vm221_vm0, %v918_v0 }
   0xe   : > { %236 = vst.msk [vmem:[#allocation2 + $0x70] sm:$0xff] %vm221_vm0, %v918_v0  ;;  %237 = vst.msk [vmem:[#allocation2 + $0x78] sm:$0xff] %vm221_vm0, %v918_v0  ;;  %s191_s13 = scalar_select %p190_p4, %s908_s9, 1  ;;  %v486_v28 = vld [vmem:[#allocation2 + $0x10] sm:$0xff]  ;;  %v484_v31 = vld [vmem:[#allocation2] sm:$0xff] }
   0xf   : > { %v487_v39 = vld [vmem:[#allocation2 + $0x18] sm:$0xff]  ;;  %v485_v45 = vld [vmem:[#allocation2 + $0x8] sm:$0xff]  ;;  %s1093_s21 = smov (!%p1007_p5, %s728_s21), 31 }
  0x10   : > { %s748_s14 = sshll.u32 %s191_s13, 6  ;;  %s729_s23 = sshll.u32 %s1093_s21, 3 }
  0x11   : > { %s977_s17 = scalar_lea.vmem %s1084_s0, %s748_s14  ;;  %s985_s20 = scalar_lea.vmem %s1085_s1, %s748_s14 }
  0x12   : > { %v878_v1 = vld [vmem:[%s977_s17] sm:$0xff]   ;;  %v879_v2 = vld [vmem:[%s977_s17 + $0x8] sm:$0xff]   ;;  %v880_v3 = vld [vmem:[%s977_s17 + $0x10] sm:$0xff]   ;;  %s1033_s26 = scalar_lea.vmem %s1086_s2, %s729_s23 }
  0x13   : > { %805 = vmatprep.subr.bf16.mxu0 %v878_v1  ;;  %837 = vmatprep.subr.bf16.mxu1 %v878_v1  ;;  %v881_v4 = vld [vmem:[%s977_s17 + $0x18] sm:$0xff]   ;;  %v886_v5 = vld [vmem:[%s985_s20] sm:$0xff]   ;;  %v883_v8 = vld [vmem:[%s977_s17 + $0x28] sm:$0xff]  }
  0x14   : > { %806 = vmatpush3.bf16.msra.mxu0 %v878_v1  ;;  %845 = vmatpush3.bf16.msra.mxu1 %v878_v1  ;;  %v887_v6 = vld [vmem:[%s985_s20 + $0x20] sm:$0xff]   ;;  %v884_v9 = vld [vmem:[%s977_s17 + $0x30] sm:$0xff]   ;;  %v885_v10 = vld [vmem:[%s977_s17 + $0x38] sm:$0xff]  }
  0x15   : > { %807 = vmatprep.subr.bf16.mxu0 %v879_v2  ;;  %838 = vmatprep.subr.bf16.mxu1 %v879_v2  ;;  %v882_v7 = vld [vmem:[%s977_s17 + $0x20] sm:$0xff]   ;;  %v888_v11 = vld [vmem:[%s985_s20 + $0x8] sm:$0xff]   ;;  %v890_v13 = vld [vmem:[%s985_s20 + $0x10] sm:$0xff]  }
  0x16   : > { %821 = vmatprep.mubr.bf16.mxu0 %v886_v5  ;;  %829 = vmatprep.mubr.bf16.mxu1 %v887_v6  ;;  %v889_v12 = vld [vmem:[%s985_s20 + $0x28] sm:$0xff]   ;;  %v891_v14 = vld [vmem:[%s985_s20 + $0x30] sm:$0xff]   ;;  %v892_v15 = vld [vmem:[%s985_s20 + $0x18] sm:$0xff]  }
  0x17   : > { %v893_v16 = vld [vmem:[%s985_s20 + $0x38] sm:$0xff]   ;;  %v782_v17 = vld [vmem:[%s977_s17 + $0x8] sm:$0xff]   ;;  %v751_v19 = vld [vmem:[%s977_s17] sm:$0xff]  }
  0x18   : > { %808 = vmatpush3.bf16.msra.mxu0 %v879_v2  ;;  %846 = vmatpush3.bf16.msra.mxu1 %v879_v2  ;;  %v786_v18 = vld [vmem:[%s977_s17 + $0x28] sm:$0xff]   ;;  %v785_v20 = vld [vmem:[%s977_s17 + $0x20] sm:$0xff]   ;;  %v756_v21 = vunpack.c.l.bf16 %v782_v17  ;;  %v752_v23 = vunpack.c.l.bf16 %v751_v19  ;;  %v757_v25 = vunpack.c.h.bf16 %v782_v17  ;;  %v494_v30 = vld [vmem:[#allocation2 + $0x50] sm:$0xff]  ;;  %v753_v32 = vunpack.c.h.bf16 %v751_v19 }
  0x19   : > { %809 = vmatprep.subr.bf16.mxu0 %v880_v3  ;;  %839 = vmatprep.subr.bf16.mxu1 %v880_v3  ;;  %v772_v22 = vunpack.c.l.bf16 %v786_v18  ;;  %v768_v24 = vunpack.c.l.bf16 %v785_v20  ;;  %v773_v26 = vunpack.c.h.bf16 %v786_v18  ;;  %v769_v33 = vunpack.c.h.bf16 %v785_v20  ;;  %v492_v38 = vld [vmem:[#allocation2 + $0x40] sm:$0xff]  ;;  %v495_v40 = vld [vmem:[#allocation2 + $0x58] sm:$0xff]  ;;  %v493_v54 = vld [vmem:[#allocation2 + $0x48] sm:$0xff] }
  0x1a   : > { %v784_v46 = vld [vmem:[%s977_s17 + $0x18] sm:$0xff]   ;;  %v783_v55 = vld [vmem:[%s977_s17 + $0x10] sm:$0xff]   ;;  %v496_v18 = vld [vmem:[#allocation2 + $0x60] sm:$0xff] }
  0x1b   : > { %v788_v47 = vld [vmem:[%s977_s17 + $0x38] sm:$0xff]   ;;  %v787_v56 = vld [vmem:[%s977_s17 + $0x30] sm:$0xff]   ;;  %v764_v63 = vunpack.c.l.bf16 %v784_v46  ;;  %v765_v5 = vunpack.c.h.bf16 %v784_v46 }
  0x1c   : > { %810 = vmatpush3.bf16.msra.mxu0 %v880_v3  ;;  %847 = vmatpush3.bf16.msra.mxu1 %v880_v3  ;;  %v780_v0 = vunpack.c.l.bf16 %v788_v47  ;;  %v760_v3 = vunpack.c.l.bf16 %v783_v55  ;;  %v781_v6 = vunpack.c.h.bf16 %v788_v47 }
  0x1d   : > { %811 = vmatprep.subr.bf16.mxu0 %v881_v4  ;;  %840 = vmatprep.subr.bf16.mxu1 %v881_v4 }
  0x20   : > { %812 = vmatpush3.bf16.msra.mxu0 %v881_v4  ;;  %848 = vmatpush3.bf16.msra.mxu1 %v881_v4  ;;  %v776_v4 = vunpack.c.l.bf16 %v787_v56 }
  0x21   : > { %813 = vmatprep.subr.bf16.mxu0 %v882_v7  ;;  %841 = vmatprep.subr.bf16.mxu1 %v882_v7 }
  0x24   : > { %814 = vmatpush3.bf16.msra.mxu0 %v882_v7  ;;  %849 = vmatpush3.bf16.msra.mxu1 %v882_v7 }
  0x25   : > { %815 = vmatprep.subr.bf16.mxu0 %v883_v8  ;;  %842 = vmatprep.subr.bf16.mxu1 %v883_v8 }
  0x28   : > { %816 = vmatpush3.bf16.msra.mxu0 %v883_v8  ;;  %850 = vmatpush3.bf16.msra.mxu1 %v883_v8  ;;  %v490_v8 = vld [vmem:[#allocation2 + $0x30] sm:$0xff] }
  0x29   : > { %817 = vmatprep.subr.bf16.mxu0 %v884_v9  ;;  %843 = vmatprep.subr.bf16.mxu1 %v884_v9 }
  0x2c   : > { %818 = vmatpush3.bf16.msra.mxu0 %v884_v9  ;;  %851 = vmatpush3.bf16.msra.mxu1 %v884_v9 }
  0x2d   : > { %819 = vmatprep.subr.bf16.mxu0 %v885_v10  ;;  %844 = vmatprep.subr.bf16.mxu1 %v885_v10 }
  0x30   : > { %820 = vmatpush3.bf16.msra.mxu0 %v885_v10  ;;  %852 = vmatpush3.bf16.msra.mxu1 %v885_v10  ;;  %v498_v10 = vld [vmem:[#allocation2 + $0x70] sm:$0xff] }
  0x33   : > { %822 = vmatmul.mubr.bf16.vlgmr.msra.gmra.mrb[0].mxu0 %v888_v11  ;;  %830 = vmatmul.mubr.bf16.vlgmr.msra.gmra.mrb[0].mxu1 %v889_v12  ;;  %v761_v11 = vunpack.c.h.bf16 %v783_v55  ;;  %v777_v12 = vunpack.c.h.bf16 %v787_v56 }
  0x34   : > { %825 = vmatprep.mubr.bf16.mxu0 %v890_v13  ;;  %833 = vmatprep.mubr.bf16.mxu1 %v891_v14 }
  0x3b   : > { %826 = vmatmul.mubr.bf16.gmra.mrb[4].mxu0 %v892_v15  ;;  %834 = vmatmul.mubr.bf16.gmra.mrb[4].mxu1 %v893_v16  ;;  %v488_v16 = vld [vmem:[#allocation2 + $0x20] sm:$0xff] }
 0x106   : > { %v823_v27 = vpop.f32.mrb[0].mxu0  ;;  %v831_v29 = vpop.f32.mrb[0].mxu1 }
 0x107   : > { %v518_v34 = vmul.f32 %v823_v27, %v756_v21  ;;  %v526_v35 = vmul.f32 %v831_v29, %v772_v22  ;;  %v400_v36 = vpop.f32.mrb[1].mxu0  ;;  %v432_v37 = vpop.f32.mrb[1].mxu1  ;;  %v491_v22 = vld [vmem:[#allocation2 + $0x38] sm:$0xff] }
 0x108   : > { %v516_v41 = vmul.f32 %v752_v23, %v400_v36  ;;  %v524_v42 = vmul.f32 %v768_v24, %v432_v37  ;;  %v824_v43 = vpop.f32.mrb[2].mxu0  ;;  %v832_v44 = vpop.f32.mrb[2].mxu1  ;;  %v499_v24 = vld [vmem:[#allocation2 + $0x78] sm:$0xff] }
 0x109   : > { %v550_v48 = vadd.f32 %v518_v34, %v486_v28  ;;  %v558_v49 = vadd.f32 %v526_v35, %v494_v30  ;;  %v519_v50 = vmul.f32 %v824_v43, %v757_v25  ;;  %v527_v51 = vmul.f32 %v832_v44, %v773_v26  ;;  %v403_v52 = vpop.f32.mrb[3].mxu0  ;;  %v435_v53 = vpop.f32.mrb[3].mxu1  ;;  %v489_v30 = vld [vmem:[#allocation2 + $0x28] sm:$0xff] }
 0x10a   : > { %v548_v57 = vadd.f32 %v516_v41, %v484_v31  ;;  %v556_v58 = vadd.f32 %v524_v42, %v492_v38  ;;  %v517_v59 = vmul.f32 %v753_v32, %v403_v52  ;;  %v525_v60 = vmul.f32 %v769_v33, %v435_v53  ;;  %v497_v32 = vld [vmem:[#allocation2 + $0x68] sm:$0xff] }
 0x10b   : > { %567 = vst.msk [vmem:[#allocation2 + $0x10] sm:$0xff] %vm221_vm0, %v550_v48  ;;  %575 = vst.msk [vmem:[#allocation2 + $0x50] sm:$0xff] %vm221_vm0, %v558_v49  ;;  %v551_v61 = vadd.f32 %v519_v50, %v487_v39  ;;  %v559_v62 = vadd.f32 %v527_v51, %v495_v40 }
 0x10c   : > { %565 = vst.msk [vmem:[#allocation2] sm:$0xff] %vm221_vm0, %v548_v57  ;;  %573 = vst.msk [vmem:[#allocation2 + $0x40] sm:$0xff] %vm221_vm0, %v556_v58  ;;  %v549_v1 = vadd.f32 %v517_v59, %v485_v45  ;;  %v557_v2 = vadd.f32 %v525_v60, %v493_v54 }
 0x10d   : > { %568 = vst.msk [vmem:[#allocation2 + $0x18] sm:$0xff] %vm221_vm0, %v551_v61  ;;  %576 = vst.msk [vmem:[#allocation2 + $0x58] sm:$0xff] %vm221_vm0, %v559_v62 }
 0x10e   : > { %566 = vst.msk [vmem:[#allocation2 + $0x8] sm:$0xff] %vm221_vm0, %v549_v1  ;;  %574 = vst.msk [vmem:[#allocation2 + $0x48] sm:$0xff] %vm221_vm0, %v557_v2  ;;  %v827_v7 = vpop.f32.mrb[4].mxu0  ;;  %v835_v9 = vpop.f32.mrb[4].mxu1 }
 0x10f   : > { %v522_v13 = vmul.f32 %v827_v7, %v764_v63  ;;  %v530_v14 = vmul.f32 %v835_v9, %v780_v0  ;;  %v416_v15 = vpop.f32.mrb[5].mxu0  ;;  %v448_v17 = vpop.f32.mrb[5].mxu1 }
 0x110   : > { %v520_v19 = vmul.f32 %v760_v3, %v416_v15  ;;  %v528_v20 = vmul.f32 %v776_v4, %v448_v17  ;;  %v828_v21 = vpop.f32.mrb[6].mxu0  ;;  %v836_v23 = vpop.f32.mrb[6].mxu1 }
 0x111   : > { %v554_v25 = vadd.f32 %v522_v13, %v490_v8  ;;  %v562_v26 = vadd.f32 %v530_v14, %v498_v10  ;;  %v523_v27 = vmul.f32 %v828_v21, %v765_v5  ;;  %v531_v28 = vmul.f32 %v836_v23, %v781_v6  ;;  %v419_v29 = vpop.f32.mrb[7].mxu0  ;;  %v451_v31 = vpop.f32.mrb[7].mxu1 }
 0x112   : > { %v585_v33 = vld [vmem:[#allocation2 + $0x10] sm:$0xff]  ;;  %v552_v35 = vadd.f32 %v520_v19, %v488_v16  ;;  %v560_v36 = vadd.f32 %v528_v20, %v496_v18  ;;  %v521_v37 = vmul.f32 %v761_v11, %v419_v29  ;;  %v529_v38 = vmul.f32 %v777_v12, %v451_v31 }
 0x113   : > { %v593_v34 = vld [vmem:[#allocation2 + $0x50] sm:$0xff]  ;;  %v601_v39 = vmul.f32 0.5, %v585_v33  ;;  %v583_v41 = vld [vmem:[#allocation2] sm:$0xff]  ;;  %571 = vst.msk [vmem:[#allocation2 + $0x30] sm:$0xff] %vm221_vm0, %v554_v25  ;;  %579 = vst.msk [vmem:[#allocation2 + $0x70] sm:$0xff] %vm221_vm0, %v562_v26  ;;  %v555_v43 = vadd.f32 %v523_v27, %v491_v22  ;;  %v563_v44 = vadd.f32 %v531_v28, %v499_v24 }
 0x114   : > { %v609_v40 = vmul.f32 0.5, %v593_v34  ;;  %v591_v42 = vld [vmem:[#allocation2 + $0x40] sm:$0xff]  ;;  %v599_v45 = vmul.f32 0.5, %v583_v41  ;;  %v586_v47 = vld [vmem:[#allocation2 + $0x18] sm:$0xff]  ;;  %569 = vst.msk [vmem:[#allocation2 + $0x20] sm:$0xff] %vm221_vm0, %v552_v35  ;;  %577 = vst.msk [vmem:[#allocation2 + $0x60] sm:$0xff] %vm221_vm0, %v560_v36  ;;  %v553_v49 = vadd.f32 %v521_v37, %v489_v30  ;;  %v561_v50 = vadd.f32 %v529_v38, %v497_v32 }
 0x115   : > { %v607_v46 = vmul.f32 0.5, %v591_v42  ;;  %v594_v48 = vld [vmem:[#allocation2 + $0x58] sm:$0xff]  ;;  %617 = vst.msk [vmem:[%s1033_s26 + $0x10] sm:$0xff] %vm221_vm0, %v601_v39  ;;  %v602_v51 = vmul.f32 0.5, %v586_v47  ;;  %v584_v53 = vld [vmem:[#allocation2 + $0x8] sm:$0xff]  ;;  %572 = vst.msk [vmem:[#allocation2 + $0x38] sm:$0xff] %vm221_vm0, %v555_v43 }
 0x116   : > { %625 = vst.msk [vmem:[%s1033_s26 + $0x50] sm:$0xff] %vm221_vm0, %v609_v40  ;;  %v610_v52 = vmul.f32 0.5, %v594_v48  ;;  %v592_v54 = vld [vmem:[#allocation2 + $0x48] sm:$0xff]  ;;  %580 = vst.msk [vmem:[#allocation2 + $0x78] sm:$0xff] %vm221_vm0, %v563_v44  ;;  %v600_v55 = vmul.f32 0.5, %v584_v53 }
 0x117   : > { %615 = vst.msk [vmem:[%s1033_s26] sm:$0xff] %vm221_vm0, %v599_v45  ;;  %623 = vst.msk [vmem:[%s1033_s26 + $0x40] sm:$0xff] %vm221_vm0, %v607_v46  ;;  %v608_v56 = vmul.f32 0.5, %v592_v54 }
 0x118   : > { %570 = vst.msk [vmem:[#allocation2 + $0x28] sm:$0xff] %vm221_vm0, %v553_v49  ;;  %578 = vst.msk [vmem:[#allocation2 + $0x68] sm:$0xff] %vm221_vm0, %v561_v50 }
 0x119   : > { %618 = vst.msk [vmem:[%s1033_s26 + $0x18] sm:$0xff] %vm221_vm0, %v602_v51  ;;  %626 = vst.msk [vmem:[%s1033_s26 + $0x58] sm:$0xff] %vm221_vm0, %v610_v52 }
 0x11a   : > { %616 = vst.msk [vmem:[%s1033_s26 + $0x8] sm:$0xff] %vm221_vm0, %v600_v55  ;;  %624 = vst.msk [vmem:[%s1033_s26 + $0x48] sm:$0xff] %vm221_vm0, %v608_v56  ;;  %v589_v57 = vld [vmem:[#allocation2 + $0x30] sm:$0xff] }
 0x11b   : > { %v597_v58 = vld [vmem:[#allocation2 + $0x70] sm:$0xff]  ;;  %v605_v59 = vmul.f32 0.5, %v589_v57  ;;  %v587_v61 = vld [vmem:[#allocation2 + $0x20] sm:$0xff] }
 0x11c   : > { %v613_v60 = vmul.f32 0.5, %v597_v58  ;;  %v595_v62 = vld [vmem:[#allocation2 + $0x60] sm:$0xff]  ;;  %v603_v63 = vmul.f32 0.5, %v587_v61  ;;  %v590_v1 = vld [vmem:[#allocation2 + $0x38] sm:$0xff] }
 0x11d   : > { %v611_v0 = vmul.f32 0.5, %v595_v62  ;;  %v598_v2 = vld [vmem:[#allocation2 + $0x78] sm:$0xff]  ;;  %621 = vst.msk [vmem:[%s1033_s26 + $0x30] sm:$0xff] %vm221_vm0, %v605_v59  ;;  %v606_v3 = vmul.f32 0.5, %v590_v1 }
 0x11e   : > { %629 = vst.msk [vmem:[%s1033_s26 + $0x70] sm:$0xff] %vm221_vm0, %v613_v60  ;;  %v614_v4 = vmul.f32 0.5, %v598_v2  ;;  %619 = vst.msk [vmem:[%s1033_s26 + $0x20] sm:$0xff] %vm221_vm0, %v603_v63 }
 0x11f   : > { %v588_v5 = vld [vmem:[#allocation2 + $0x28] sm:$0xff]  ;;  %627 = vst.msk [vmem:[%s1033_s26 + $0x60] sm:$0xff] %vm221_vm0, %v611_v0  ;;  %622 = vst.msk [vmem:[%s1033_s26 + $0x38] sm:$0xff] %vm221_vm0, %v606_v3 }
 0x120   : > { %v596_v6 = vld [vmem:[#allocation2 + $0x68] sm:$0xff]  ;;  %v604_v7 = vmul.f32 0.5, %v588_v5  ;;  %630 = vst.msk [vmem:[%s1033_s26 + $0x78] sm:$0xff] %vm221_vm0, %v614_v4 }
 0x121   : > { %v612_v8 = vmul.f32 0.5, %v596_v6 }
 0x122   : > { %620 = vst.msk [vmem:[%s1033_s26 + $0x28] sm:$0xff] %vm221_vm0, %v604_v7 }
 0x123   : > { %628 = vst.msk [vmem:[%s1033_s26 + $0x68] sm:$0xff] %vm221_vm0, %v612_v8 }
 0x124 PF: > { %s12_s11 = sadd.s32 1, %s916_s11   ;;  %s1088_s9 = smov %s912_s10 }
 0x125   : > { %p9_p6 = scmp.ge.s32.totalorder %s12_s11, 4   ;;  %s1089_s10 = smov %s1091_s12 }
 0x127   :  { %11 = sbr.rel (!%p9_p6) target bundleno = 2 (0x2), region = 70 }

</bundles_post_ra>
